<compile_context>
chip_gen: v7x
topology: tpu7x:2x2x1
jax: 0.10.0
libtpu: 0.0.40
codegen_flags: <defaults>
</compile_context>

<pallas_src>
import functools
import inspect
import math

import jax
import jax.numpy as jnp
from jax.experimental import pallas as pl
from jax.experimental.pallas import tpu as pltpu

TAU = 0.07
INV_TAU = 1.0 / TAU
SQRT_INV_TAU = math.sqrt(INV_TAU)
NORM_EPS = 1e-12          # F.normalize default eps (module's self.eps=1e-5 unused in forward)


def _round_up(x, m):
    return (x + m - 1) // m * m


def _vmem_capacity_bytes():
    """Per-core VMEM capacity (128 MiB on v5e/v6e, 64 MiB per TC on v7x)."""
    try:
        cap = int(pltpu.get_tpu_info().vmem_capacity_bytes)
    except Exception:
        cap = 64 << 20          # conservative fallback (fits every generation)
    return max(cap, 32 << 20)


def _supports_buffered_blockspec():
    if not hasattr(pl, "Buffered"):
        return False
    try:
        params = inspect.signature(pl.BlockSpec).parameters
    except (TypeError, ValueError):
        return True             # cannot introspect; rely on call-time fallback
    return "pipeline_mode" in params


_HAS_BUFFERED = _supports_buffered_blockspec()


def _pick_tm(n, d, key_bytes, budget, tm=None):
    """Row-tile size.

    Multiple of 8 always; when it does not cover all rows it must also be a
    multiple of 128 so the lane-dense (1, TM) output block satisfies the
    (8, 128) tiling rule.  Hard floor of 128 in the multi-tile case (review:
    never shrink the MXU row dimension in response to VMEM pressure)."""
    n8 = _round_up(n, 8)
    n128 = _round_up(n, 128)
    if tm is not None:
        t = max(8, _round_up(int(tm), 8))
        if t >= n8:
            return n8                                   # single tile
        return min(_round_up(t, 128), n128)
    if n8 <= 256:
        return n8                                       # single tile, no padding waste
    keys_bytes = 3 * n8 * d * key_bytes                 # single-buffered resident keys
    avail = max(budget - keys_bytes, 0)
    t = int(avail // (12 * n8 * 4)) // 128 * 128        # ~12 live (TM, N) f32 working tiles
    t = max(128, min(512, t))                           # floor 128, cap 512
    return min(t, n128)


def _normalize3_kernel(l_ref, v_ref, a_ref, ol_ref, ov_ref, oa_ref):
    """Row-wise L2 normalization (scaled by sqrt(1/tau)) of a (TM, D) tile of
    each modality.  Done once so pass 2 never redoes it per row tile."""
    def norm(x_ref, o_ref):
        x = x_ref[...].astype(jnp.float32)
        ssq = jnp.sum(x * x, axis=1, keepdims=True)
        # x / max(||x||, eps) == x * rsqrt(max(||x||^2, eps^2))  (EUP rsqrt, no divide).
        # sqrt(1/tau) folded here (before any bf16 rounding) so the Gram in
        # pass 2 already carries the 1/tau factor.
        scale = jax.lax.rsqrt(jnp.maximum(ssq, NORM_EPS * NORM_EPS)) * SQRT_INV_TAU
        o_ref[...] = (x * scale).astype(o_ref.dtype)

    norm(l_ref, ol_ref)
    norm(v_ref, ov_ref)
    norm(a_ref, oa_ref)


def _relation_rows_kernel(nl_ref, nv_ref, na_ref, out_ref, *, tm, n_valid):
    """For one row tile: Gram / masked row-softmax for all three modalities and
    the per-row sum of the three squared-difference terms (lane-dense output)."""
    i = pl.program_id(0)
    n_pad = nl_ref.shape[0]
    align = 128 if tm % 128 == 0 else 8
    start = pl.multiple_of(i * tm, align)

    # Validity mask built once per tile and shared by all three modalities:
    # drop the diagonal (reference removes it before the softmax) and, when the
    # row count was padded, drop the zero-padded key columns too.
    col_ids = jax.lax.broadcasted_iota(jnp.int32, (tm, n_pad), 1)
    row_ids = start + jax.lax.broadcasted_iota(jnp.int32, (tm, n_pad), 0)
    valid = col_ids != row_ids
    if n_valid < n_pad:
        valid = valid & (col_ids < n_valid)

    def rel_softmax(x_ref):
        keys = x_ref[...]                            # (N_pad, D) resident, sqrt(1/tau)-scaled
        q = x_ref[pl.ds(start, tm), :]               # (TM, D) aligned query slice
        # Gram tile on the MXU, contracting the feature dim of both operands
        # (no transpose / relayout of the keys).  g already equals cos/tau.
        g = jax.lax.dot_general(q, keys, (((1,), (1,)), ((), ())),
                                preferred_element_type=jnp.float32)
        # Analytic softmax max 1/tau: cosine <= 1 and the diagonal (== 1/tau)
        # is dropped; exponent in [-2/tau, ~0] -> no under/overflow.
        e = jnp.exp(g - INV_TAU)
        e = jnp.where(valid, e, 0.0)
        denom = jnp.sum(e, axis=1, keepdims=True)
        inv = pl.reciprocal(denom, approx=True)      # EUP reciprocal
        inv = inv * (2.0 - denom * inv)              # one Newton step -> f32 accuracy
        return e * inv

    p_l = rel_softmax(nl_ref)
    p_v = rel_softmax(nv_ref)
    p_a = rel_softmax(na_ref)

    d_lv = p_l - p_v
    d_la = p_l - p_a
    d_av = p_a - p_v
    total = jnp.sum(d_lv * d_lv + d_la * d_la + d_av * d_av, axis=1)   # (TM,)
    out_ref[...] = total[None, :]                                      # lane-dense (1, TM)


def relation_loss(thi_l, thi_v, thi_a, *, tm=None, keys_dtype=jnp.bfloat16):
    """Pallas forward of Relation(tau=0.07).

    Inputs: three (N, D) arrays.  Returns a f32 scalar loss.
    keys_dtype=bf16 (default) halves HBM traffic / resident VMEM and uses the
    native bf16 MXU path; keys_dtype=jnp.float32 reproduces the f32 reference
    to ~1e-5 relative."""
    n, d = thi_l.shape
    keys_dtype = jnp.dtype(keys_dtype)
    key_bytes = keys_dtype.itemsize

    cap = _vmem_capacity_bytes()
    budget = int(cap * 0.85)         # per-TensorCore working budget
    limit_cap = int(cap * 0.90)      # never ask Mosaic for more than ~90% of VMEM

    t = _pick_tm(n, d, key_bytes, budget, tm)
    n_pad = _round_up(n, t)
    pad = n_pad - n
    grid_n = n_pad // t

    def prep(x):
        x = x.astype(jnp.float32)
        if pad:
            # Zero rows normalize to zero (eps clamp); their key columns are
            # masked in pass 2 and their query rows are sliced off the output.
            x = jnp.pad(x, ((0, pad), (0, 0)))
        return x

    l_p, v_p, a_p = prep(thi_l), prep(thi_v), prep(thi_a)

    # ---- pass 1: row-wise L2 normalization * sqrt(1/tau), tiled over rows ----
    norm_vmem = int(min(limit_cap, max(8 << 20, 6 * t * d * (4 + key_bytes) + (2 << 20))))
    norm_l, norm_v, norm_a = pl.pallas_call(
        _normalize3_kernel,
        out_shape=tuple(jax.ShapeDtypeStruct((n_pad, d), keys_dtype) for _ in range(3)),
        grid_spec=pltpu.PrefetchScalarGridSpec(
            num_scalar_prefetch=0,
            grid=(grid_n,),
            in_specs=[pl.BlockSpec((t, d), lambda i: (i, 0))] * 3,
            out_specs=[pl.BlockSpec((t, d), lambda i: (i, 0))] * 3,
        ),
        compiler_params=pltpu.CompilerParams(
            dimension_semantics=("parallel",),
            vmem_limit_bytes=norm_vmem),
    )(l_p, v_p, a_p)

    # ---- pass 2: per-row-tile Gram + masked softmax + squared-diff row sums ----
    kernel = functools.partial(_relation_rows_kernel, tm=t, n_valid=n)

    def run_pass2(single_buffer):
        bufs = 1 if single_buffer else 2
        spec_kwargs = {}
        if single_buffer and _HAS_BUFFERED:
            # Constant index_map: the keys are fetched once, so a second buffer
            # is pure VMEM waste (matters most on v7x's 64 MiB/TC).
            spec_kwargs["pipeline_mode"] = pl.Buffered(1)
        key_spec = pl.BlockSpec((n_pad, d), lambda i: (0, 0), **spec_kwargs)
        rel_vmem = int(min(limit_cap,
                           max(16 << 20,
                               3 * bufs * n_pad * d * key_bytes        # resident keys
                               + 12 * t * n_pad * 4                    # live (TM, N) f32 tiles
                               + (4 << 20))))
        return pl.pallas_call(
            kernel,
            out_shape=jax.ShapeDtypeStruct((1, n_pad), jnp.float32),
            grid_spec=pltpu.PrefetchScalarGridSpec(
                num_scalar_prefetch=0,
                grid=(grid_n,),
                in_specs=[key_spec] * 3,
                out_specs=pl.BlockSpec((1, t), lambda i: (0, i)),
            ),
            compiler_params=pltpu.CompilerParams(
                dimension_semantics=("parallel",),   # v7x: two TCs split the row tiles
                vmem_limit_bytes=rel_vmem),
        )(norm_l, norm_v, norm_a)

    if _HAS_BUFFERED:
        try:
            row_sums = run_pass2(True)
        except Exception:
            # pipeline_mode / Buffered(1) not supported by this lowering:
            # fall back to the default double-buffered (still correct) path.
            row_sums = run_pass2(False)
    else:
        row_sums = run_pass2(False)

    # Padded rows land in columns >= n and are sliced off.
    return jnp.sum(row_sums[0, :n]) / n


def _relation_loss_ref(thi_l, thi_v, thi_a):
    """Pure-JAX reference mirroring the PyTorch forward (for the correctness check)."""
    def row_normalize(x):
        nrm = jnp.sqrt(jnp.sum(x * x, axis=1, keepdims=True))
        return x / jnp.maximum(nrm, NORM_EPS)

    n = thi_l.shape[0]

    def out_mat(x):
        xn = row_normalize(x.astype(jnp.float32))
        r = (xn @ xn.T) / TAU
        r = r - r * jnp.eye(n, dtype=r.dtype)
        # flatten trick: drop the diagonal -> (N, N-1), then softmax over rows
        off = r.flatten()[:-1].reshape(n - 1, n + 1)[:, 1:].flatten().reshape(n, n - 1)
        return jax.nn.softmax(off, axis=1)

    pl_, pv, pa = out_mat(thi_l), out_mat(thi_v), out_mat(thi_a)
    l_v = jnp.sum((pl_ - pv) ** 2, axis=1)
    l_a = jnp.sum((pl_ - pa) ** 2, axis=1)
    v_a = jnp.sum((pa - pv) ** 2, axis=1)
    return l_v.mean() + l_a.mean() + v_a.mean()


if __name__ == "__main__":
    key = jax.random.PRNGKey(0)
    k1, k2, k3, k4, k5, k6 = jax.random.split(key, 6)

    # Case 1: small batch of embeddings, f32 keys -> bit-faithful to the reference.
    N, D = 8, 32
    thi_l = jax.random.normal(k1, (N, D), dtype=jnp.float32)
    thi_v = jax.random.normal(k2, (N, D), dtype=jnp.float32)
    thi_a = jax.random.normal(k3, (N, D), dtype=jnp.float32)

    loss = jax.block_until_ready(relation_loss(thi_l, thi_v, thi_a, keys_dtype=jnp.float32))
    ref = jax.block_until_ready(_relation_loss_ref(thi_l, thi_v, thi_a))
    assert jnp.isfinite(loss), "non-finite loss (f32 path)"
    assert jnp.allclose(loss, ref, rtol=1e-4, atol=1e-6), (loss, ref)

    # Case 2: multi-tile + padded path (explicit TM forces 2 row tiles with 56
    # padded rows/columns) using the default bf16 keys.  bf16 cosine rounding is
    # amplified by 1/tau in the exponent, so the tolerance is intentionally loose.
    N2, D2 = 200, 64
    l2 = jax.random.normal(k4, (N2, D2), dtype=jnp.float32)
    v2 = jax.random.normal(k5, (N2, D2), dtype=jnp.float32)
    a2 = jax.random.normal(k6, (N2, D2), dtype=jnp.float32)
    loss2 = jax.block_until_ready(relation_loss(l2, v2, a2, tm=128))
    ref2 = jax.block_until_ready(_relation_loss_ref(l2, v2, a2))
    assert jnp.isfinite(loss2), "non-finite loss (tiled bf16 path)"
    assert jnp.allclose(loss2, ref2, rtol=0.15, atol=1e-6), (loss2, ref2)

    print("KERNEL_OK")
</pallas_src>

<mosaic_0001>
module attributes {stable_mosaic.version = 11 : i64} {
  func.func @_normalize3_kernel(%arg0: i32, %arg1: memref<8x32xf32, #tpu.memory_space<vmem>>, %arg2: memref<8x32xf32, #tpu.memory_space<vmem>>, %arg3: memref<8x32xf32, #tpu.memory_space<vmem>>, %arg4: memref<8x32xf32, #tpu.memory_space<vmem>>, %arg5: memref<8x32xf32, #tpu.memory_space<vmem>>, %arg6: memref<8x32xf32, #tpu.memory_space<vmem>>) attributes {dimension_semantics = [#tpu.dimension_semantics<parallel>], iteration_bounds = array<i64: 1>, scalar_prefetch = 0 : i64, scratch_operands = 0 : i64, tpu.core_type = #tpu.core_type<tc>, window_params = [{transform_indices = @transform_0, window_bounds = array<i64: 8, 32>}, {transform_indices = @transform_1, window_bounds = array<i64: 8, 32>}, {transform_indices = @transform_2, window_bounds = array<i64: 8, 32>}, {transform_indices = @transform_3, window_bounds = array<i64: 8, 32>}, {transform_indices = @transform_4, window_bounds = array<i64: 8, 32>}, {transform_indices = @transform_5, window_bounds = array<i64: 8, 32>}]} {
    %c0 = arith.constant 0 : index
    %c0_0 = arith.constant 0 : index
    %0 = vector.load %arg1[%c0, %c0_0] : memref<8x32xf32, #tpu.memory_space<vmem>>, vector<8x32xf32>
    %1 = arith.mulf %0, %0 : vector<8x32xf32>
    %cst = arith.constant dense<0.000000e+00> : vector<8xf32>
    %2 = vector.multi_reduction <add>, %1, %cst [1] : vector<8x32xf32> to vector<8xf32>
    %3 = vector.shape_cast %2 : vector<8xf32> to vector<8x1xf32>
    %cst_1 = arith.constant 1.000000e-24 : f32
    %4 = vector.broadcast %cst_1 : f32 to vector<8x1xf32>
    %5 = arith.maximumf %3, %4 : vector<8x1xf32>
    %6 = math.rsqrt %5 : vector<8x1xf32>
    %cst_2 = arith.constant 3.77964473 : f32
    %7 = vector.broadcast %cst_2 : f32 to vector<8x1xf32>
    %8 = arith.mulf %6, %7 : vector<8x1xf32>
    %9 = vector.broadcast %8 : vector<8x1xf32> to vector<8x32xf32>
    %10 = arith.mulf %0, %9 : vector<8x32xf32>
    %c0_3 = arith.constant 0 : index
    %c0_4 = arith.constant 0 : index
    %11 = vector.load %arg4[%c0_3, %c0_4] : memref<8x32xf32, #tpu.memory_space<vmem>>, vector<8x32xf32>
    tpu.vector_store %arg4[%c0_3, %c0_4], %10 {strides = array<i32>} : memref<8x32xf32, #tpu.memory_space<vmem>>, vector<8x32xf32>,
    %c0_5 = arith.constant 0 : index
    %c0_6 = arith.constant 0 : index
    %12 = vector.load %arg2[%c0_5, %c0_6] : memref<8x32xf32, #tpu.memory_space<vmem>>, vector<8x32xf32>
    %13 = arith.mulf %12, %12 : vector<8x32xf32>
    %cst_7 = arith.constant dense<0.000000e+00> : vector<8xf32>
    %14 = vector.multi_reduction <add>, %13, %cst_7 [1] : vector<8x32xf32> to vector<8xf32>
    %15 = vector.shape_cast %14 : vector<8xf32> to vector<8x1xf32>
    %cst_8 = arith.constant 1.000000e-24 : f32
    %16 = vector.broadcast %cst_8 : f32 to vector<8x1xf32>
    %17 = arith.maximumf %15, %16 : vector<8x1xf32>
    %18 = math.rsqrt %17 : vector<8x1xf32>
    %cst_9 = arith.constant 3.77964473 : f32
    %19 = vector.broadcast %cst_9 : f32 to vector<8x1xf32>
    %20 = arith.mulf %18, %19 : vector<8x1xf32>
    %21 = vector.broadcast %20 : vector<8x1xf32> to vector<8x32xf32>
    %22 = arith.mulf %12, %21 : vector<8x32xf32>
    %c0_10 = arith.constant 0 : index
    %c0_11 = arith.constant 0 : index
    %23 = vector.load %arg5[%c0_10, %c0_11] : memref<8x32xf32, #tpu.memory_space<vmem>>, vector<8x32xf32>
    tpu.vector_store %arg5[%c0_10, %c0_11], %22 {strides = array<i32>} : memref<8x32xf32, #tpu.memory_space<vmem>>, vector<8x32xf32>,
    %c0_12 = arith.constant 0 : index
    %c0_13 = arith.constant 0 : index
    %24 = vector.load %arg3[%c0_12, %c0_13] : memref<8x32xf32, #tpu.memory_space<vmem>>, vector<8x32xf32>
    %25 = arith.mulf %24, %24 : vector<8x32xf32>
    %cst_14 = arith.constant dense<0.000000e+00> : vector<8xf32>
    %26 = vector.multi_reduction <add>, %25, %cst_14 [1] : vector<8x32xf32> to vector<8xf32>
    %27 = vector.shape_cast %26 : vector<8xf32> to vector<8x1xf32>
    %cst_15 = arith.constant 1.000000e-24 : f32
    %28 = vector.broadcast %cst_15 : f32 to vector<8x1xf32>
    %29 = arith.maximumf %27, %28 : vector<8x1xf32>
    %30 = math.rsqrt %29 : vector<8x1xf32>
    %cst_16 = arith.constant 3.77964473 : f32
    %31 = vector.broadcast %cst_16 : f32 to vector<8x1xf32>
    %32 = arith.mulf %30, %31 : vector<8x1xf32>
    %33 = vector.broadcast %32 : vector<8x1xf32> to vector<8x32xf32>
    %34 = arith.mulf %24, %33 : vector<8x32xf32>
    %c0_17 = arith.constant 0 : index
    %c0_18 = arith.constant 0 : index
    %35 = vector.load %arg6[%c0_17, %c0_18] : memref<8x32xf32, #tpu.memory_space<vmem>>, vector<8x32xf32>
    tpu.vector_store %arg6[%c0_17, %c0_18], %34 {strides = array<i32>} : memref<8x32xf32, #tpu.memory_space<vmem>>, vector<8x32xf32>,
    return
  }
  func.func @transform_0(%arg0: i32) -> (i32, i32) {
    %c0_i32 = arith.constant 0 : i32
    %c0_i32_0 = arith.constant 0 : i32
    return %arg0, %c0_i32 : i32, i32
  }
  func.func @transform_1(%arg0: i32) -> (i32, i32) {
    %c0_i32 = arith.constant 0 : i32
    %c0_i32_0 = arith.constant 0 : i32
    return %arg0, %c0_i32 : i32, i32
  }
  func.func @transform_2(%arg0: i32) -> (i32, i32) {
    %c0_i32 = arith.constant 0 : i32
    %c0_i32_0 = arith.constant 0 : i32
    return %arg0, %c0_i32 : i32, i32
  }
  func.func @transform_3(%arg0: i32) -> (i32, i32) {
    %c0_i32 = arith.constant 0 : i32
    %c0_i32_0 = arith.constant 0 : i32
    return %arg0, %c0_i32 : i32, i32
  }
  func.func @transform_4(%arg0: i32) -> (i32, i32) {
    %c0_i32 = arith.constant 0 : i32
    %c0_i32_0 = arith.constant 0 : i32
    return %arg0, %c0_i32 : i32, i32
  }
  func.func @transform_5(%arg0: i32) -> (i32, i32) {
    %c0_i32 = arith.constant 0 : i32
    %c0_i32_0 = arith.constant 0 : i32
    return %arg0, %c0_i32 : i32, i32
  }
}

</mosaic_0001>

<bundles_post_ra>
// kernel: tpu_custom_call.1
= control target key start
LH: loop header
LB: loop body
LE: loop exit
PB: predicated region body
PF: predicated region fallthrough
CT: control target
= control target key end

     0   :  { %11 = vsyncpa [#allocation3], 0  ;;  %s408_s0 = inlined_call_operand.hbm [shape: f32[8,32], index: 0, kind: input, shape index: {}]   ;;  %s409_s1 = inlined_call_operand.hbm [shape: f32[8,32], index: 1, kind: input, shape index: {}]   ;;  %s410_s2 = inlined_call_operand.hbm [shape: f32[8,32], index: 2, kind: input, shape index: {}]   ;;  %s411_s3 = inlined_call_operand.hbm [shape: f32[8,32], index: 3, kind: output, shape index: {0}]   ;;  %s412_s4 = inlined_call_operand.hbm [shape: f32[8,32], index: 4, kind: output, shape index: {1}]   ;;  %s413_s5 = inlined_call_operand.hbm [shape: f32[8,32], index: 5, kind: output, shape index: {2}]  }
   0x1   :  { %12 = vsyncpa [#allocation6], 0 }
   0x2   :  { %13 = vsyncpa [#allocation4], 0 }
   0x3   :  { %14 = vsyncpa [#allocation10], 0  ;;  %s280_s18 = smov [#allocation5]   ;;  %s281_s20 = smov [#allocation2]  }
   0x4   :  { %s31_s19 = sshll.u32 %s280_s18, 4  ;;  %s21_s21 = sshll.u32 %s281_s20, 4  ;;  %s32_s19 = int_to_ptr.vmem [resolvable:$true] %s31_s19  ;;  %s22_s21 = int_to_ptr.vmem [resolvable:$true] %s21_s21 }
   0x5   :  { %s140_s24 = scalar_lea.hbm %s409_s1, 128 }
   0x6   :  { %p141_p0 = scmp.ne.s32.totalorder %s409_s1, %s140_s24  ;;  %p144_p1 = scmp.lt.u32.totalorder %s140_s24, %s409_s1 }
   0x8   :  { %p146_p2 = pnand %p144_p1, %p141_p0 }
   0xa   :  { %149 = shalt.err (!%p146_p2)
}
   0xb   :  { %s150_s29 = scalar_lea.vmem %s32_s19, 128  ;;  %p155_p4 = scmp.lt.s32.totalorder %s32_s19, %s32_s19 }
   0xc   :  { %p151_p3 = scmp.ne.s32.totalorder %s32_s19, %s150_s29  ;;  %p156_p5 = scmp.lt.s32.totalorder %s150_s29, %s150_s29 }
   0xe   :  { %p157_p6 = por %p156_p5, %p155_p4 }
  0x10   :  { %p158_p7 = pnand %p157_p6, %p151_p3 }
  0x12   :  { %161 = shalt.err (!%p158_p7)
}
  0x13   :  { %34 = dma.hbm_to_vmem [thread:$0]  %s409_s1, 128, %s32_s19, [#allocation6]  }
  0x14   :  { %s162_s9 = scalar_lea.hbm %s408_s0, 128 }
  0x15   :  { %p163_p8 = scmp.ne.s32.totalorder %s408_s0, %s162_s9  ;;  %p166_p9 = scmp.lt.u32.totalorder %s162_s9, %s408_s0 }
  0x17   :  { %p168_p10 = pnand %p166_p9, %p163_p8 }
  0x19   :  { %171 = shalt.err (!%p168_p10)
}
  0x1a   :  { %s172_s14 = scalar_lea.vmem %s22_s21, 128  ;;  %p177_p12 = scmp.lt.s32.totalorder %s22_s21, %s22_s21 }
  0x1b   :  { %p173_p11 = scmp.ne.s32.totalorder %s22_s21, %s172_s14  ;;  %p178_p13 = scmp.lt.s32.totalorder %s172_s14, %s172_s14 }
  0x1d   :  { %p179_p0 = por %p178_p13, %p177_p12 }
  0x1f   :  { %p180_p1 = pnand %p179_p0, %p173_p11 }
  0x21   :  { %183 = shalt.err (!%p180_p1)
}
  0x22   :  { %24 = dma.hbm_to_vmem [thread:$0]  %s408_s0, 128, %s22_s21, [#allocation3]  }
  0x23   :  { %s282_s16 = smov [#allocation7]   ;;  %s184_s20 = scalar_lea.hbm %s410_s2, 128 }
  0x24   :  { %s41_s17 = sshll.u32 %s282_s16, 4  ;;  %p185_p2 = scmp.ne.s32.totalorder %s410_s2, %s184_s20  ;;  %s42_s17 = int_to_ptr.vmem [resolvable:$true] %s41_s17 }
  0x25   :  { %p188_p3 = scmp.lt.u32.totalorder %s184_s20, %s410_s2 }
  0x27   :  { %p190_p4 = pnand %p188_p3, %p185_p2 }
  0x29   :  { %193 = shalt.err (!%p190_p4)
}
  0x2a   :  { %s194_s26 = scalar_lea.vmem %s42_s17, 128  ;;  %p199_p6 = scmp.lt.s32.totalorder %s42_s17, %s42_s17 }
  0x2b   :  { %p195_p5 = scmp.ne.s32.totalorder %s42_s17, %s194_s26  ;;  %p200_p7 = scmp.lt.s32.totalorder %s194_s26, %s194_s26 }
  0x2d   :  { %p201_p8 = por %p200_p7, %p199_p6 }
  0x2f   :  { %p202_p9 = pnand %p201_p8, %p195_p5 }
  0x31   :  { %205 = shalt.err (!%p202_p9)
}
  0x32   :  { %44 = dma.hbm_to_vmem [thread:$0]  %s410_s2, 128, %s42_s17, [#allocation6]  }
  0x33   :  { %272 = dma.done.wait [#allocation3], 128  }
  0x34   :  { %273 = vsyncadd [#allocation3], 4294967168 }
  0x35   :  { %274 = dma.done.wait [#allocation6], 256  }
  0x36   :  { %275 = vsyncadd [#allocation6], 4294967040  ;;  %vm56_vm0 = vcmask 261120   ;;  %v65_v0 = vld [vmem:[#allocation5] sm:$0xff]  ;;  %v75_v1 = vld [vmem:[#allocation7] sm:$0xff]  ;;  %s283_s2 = smov [#allocation9]  }
  0x37   :  { %v54_v2 = vld [vmem:[#allocation2] sm:$0xff]  ;;  %v66_v3 = vmul.f32 %v65_v0, %v65_v0  ;;  %v76_v4 = vmul.f32 %v75_v1, %v75_v1  ;;  %s101_s27 = sshll.u32 %s283_s2, 4  ;;  %s284_s28 = smov [#allocation11]   ;;  %s102_s27 = int_to_ptr.vmem [resolvable:$true] %s101_s27 }
  0x38   :  { %v55_v5 = vmul.f32 %v54_v2, %v54_v2  ;;  %s111_s29 = sshll.u32 %s284_s28, 4  ;;  %s285_s30 = smov [#allocation8]   ;;  %s355_s29 = int_to_ptr.vmem [resolvable:$true] %s111_s29 }
  0x39   :  { %v67_v6 = vsel %vm56_vm0, %v66_v3, 0.0  ;;  %v77_v7 = vsel %vm56_vm0, %v76_v4, 0.0  ;;  %s91_s6 = sshll.u32 %s285_s30, 4  ;;  %s206_s7 = scalar_lea.vmem %s102_s27, 128  ;;  %s358_s6 = int_to_ptr.vmem [resolvable:$true] %s91_s6 }
  0x3a   :  { %68 = vadd.xlane.f32.xlu0 %v67_v6  ;;  %78 = vadd.xlane.f32.xlu1 %v77_v7  ;;  %v57_v8 = vsel %vm56_vm0, %v55_v5, 0.0  ;;  %p207_p10 = scmp.ne.s32.totalorder %s102_s27, %s206_s7  ;;  %p211_p11 = scmp.lt.s32.totalorder %s102_s27, %s102_s27 }
  0x3b   :  { %p212_p12 = scmp.lt.s32.totalorder %s206_s7, %s206_s7 }
  0x3d   :  { %p213_p13 = por %p212_p12, %p211_p11 }
  0x3e   :  { %58 = vadd.xlane.f32.xlu0 %v57_v8 }
  0x3f   :  { %p214_p0 = pnand %p213_p13, %p207_p10 }
  0xc7   :  { %v69_v9 = vpop.xlane.xlu0 %68  ;;  %v79_v10 = vpop.xlane.xlu1 %78 }
  0xc8   :  { %v70_v11 = vmax.f32 %v69_v9, 1e-24  ;;  %v80_v12 = vmax.f32 %v79_v10, 1e-24 }
  0xca   :  { %134 = vrsqrt.f32 %v70_v11 }
  0xcb   :  { %136 = vrsqrt.f32 %v80_v12  ;;  %v59_v13 = vpop.xlane.xlu0 %58 }
  0xcc   :  { %v60_v14 = vmax.f32 %v59_v13, 1e-24 }
  0xce   :  { %138 = vrsqrt.f32 %v60_v14 }
  0xd4   :  { %v135_v15 = vpop.eup %134 }
  0xd5   :  { %v137_v16 = vpop.eup %136  ;;  %v72_v17 = vmul.f32 3.7796447, %v135_v15 }
  0xd6   :  { %v82_v18 = vmul.f32 3.7796447, %v137_v16 }
  0xd7   :  { %v73_v19 = vmul.f32 %v72_v17, %v65_v0 }
  0xd8   :  { %v139_v20 = vpop.eup %138  ;;  %v83_v21 = vmul.f32 %v82_v18, %v75_v1 }
  0xd9   :  { %74 = vst.msk [vmem:[#allocation9] sm:$0xff] %vm56_vm0, %v73_v19  ;;  %v62_v22 = vmul.f32 3.7796447, %v139_v20 }
  0xda   :  { %84 = vst.msk [vmem:[#allocation11] sm:$0xff] %vm56_vm0, %v83_v21 }
  0xdb   :  { %217 = shalt.err (!%p214_p0)
}
  0xdc   :  { %s218_s10 = scalar_lea.hbm %s412_s4, 128 }
  0xdd   :  { %p219_p1 = scmp.ne.s32.totalorder %s412_s4, %s218_s10  ;;  %p222_p2 = scmp.lt.u32.totalorder %s218_s10, %s412_s4 }
  0xdf   :  { %p224_p3 = pnand %p222_p2, %p219_p1 }
  0xe1   :  { %227 = shalt.err (!%p224_p3)
}
  0xe2   :  { %104 = dma.vmem_to_hbm [thread:$0]  %s102_s27, 128, %s412_s4, [#allocation10]   ;;  %v63_v23 = vmul.f32 %v62_v22, %v54_v2 }
  0xe3   :  { %s228_s16 = scalar_lea.vmem %s355_s29, 128  ;;  %p233_p5 = scmp.lt.s32.totalorder %s355_s29, %s355_s29 }
  0xe4   :  { %p229_p4 = scmp.ne.s32.totalorder %s355_s29, %s228_s16  ;;  %p234_p6 = scmp.lt.s32.totalorder %s228_s16, %s228_s16 }
  0xe6   :  { %p235_p7 = por %p234_p6, %p233_p5 }
  0xe8   :  { %p236_p8 = pnand %p235_p7, %p229_p4 }
  0xea   :  { %239 = shalt.err (!%p236_p8)
}
  0xeb   :  { %s240_s19 = scalar_lea.hbm %s413_s5, 128 }
  0xec   :  { %p241_p9 = scmp.ne.s32.totalorder %s413_s5, %s240_s19  ;;  %p244_p10 = scmp.lt.u32.totalorder %s240_s19, %s413_s5 }
  0xee   :  { %p246_p11 = pnand %p244_p10, %p241_p9 }
  0xf0   :  { %249 = shalt.err (!%p246_p11)
}
  0xf1   :  { %114 = dma.vmem_to_hbm [thread:$0]  %s355_s29, 128, %s413_s5, [#allocation10]   ;;  %64 = vst.msk [vmem:[#allocation8] sm:$0xff] %vm56_vm0, %v63_v23 }
  0xf2   :  { %s250_s26 = scalar_lea.vmem %s358_s6, 128  ;;  %p255_p13 = scmp.lt.s32.totalorder %s358_s6, %s358_s6 }
  0xf3   :  { %p251_p12 = scmp.ne.s32.totalorder %s358_s6, %s250_s26  ;;  %p256_p0 = scmp.lt.s32.totalorder %s250_s26, %s250_s26 }
  0xf5   :  { %p257_p1 = por %p256_p0, %p255_p13 }
  0xf7   :  { %p258_p2 = pnand %p257_p1, %p251_p12 }
  0xf9   :  { %261 = shalt.err (!%p258_p2)
}
  0xfa   :  { %s262_s2 = scalar_lea.hbm %s411_s3, 128 }
  0xfb   :  { %p263_p3 = scmp.ne.s32.totalorder %s411_s3, %s262_s2  ;;  %p266_p4 = scmp.lt.u32.totalorder %s262_s2, %s411_s3 }
  0xfd   :  { %p268_p5 = pnand %p266_p4, %p263_p3 }
  0xff   :  { %271 = shalt.err (!%p268_p5)
}
 0x100   :  { %94 = dma.vmem_to_hbm [thread:$0]  %s358_s6, 128, %s411_s3, [#allocation4]  }
 0x101   :  { %276 = dma.done.wait [#allocation4], 128  }
 0x102   :  { %277 = vsyncadd [#allocation4], 4294967168 }
 0x103   :  { %278 = dma.done.wait [#allocation10], 256  }
 0x104   :  { %279 = vsyncadd [#allocation10], 4294967040 }
 0x105   :  { %124 = vsyncpa [#allocation3], 1 }
 0x106   :  { %125 = vsyncpa [#allocation6], 1 }
 0x107   :  { %126 = vsyncpa [#allocation4], 1 }
 0x108   :  { %127 = vsyncpa [#allocation10], 1 }

</bundles_post_ra>
